<compile_context>
chip_gen: v6e
topology: v6e:2x2x1
jax: 0.10.0
libtpu: 0.0.40
codegen_flags: <defaults>
</compile_context>

<pallas_src>
from functools import partial

import jax
import jax.numpy as jnp
from jax.experimental import pallas as pl
from jax.experimental.pallas import tpu as pltpu

EPS = 1e-5                       # nn.LayerNorm eps used by timm CLIP ViT configs
_VMEM_LIMIT = 64 * 1024 * 1024   # explicit scoped-VMEM cap (safe on v5e/v6e/v7x)


def _round_up(x, m):
    return ((x + m - 1) // m) * m


def _ln(x, g, b):
    """LayerNorm over last dim, f32 math, biased variance (matches torch LayerNorm)."""
    mu = jnp.mean(x, axis=-1, keepdims=True)
    var = jnp.mean((x - mu) ** 2, axis=-1, keepdims=True)
    return (x - mu) * jax.lax.rsqrt(var + EPS) * g + b


def _cparams(*sems):
    return pltpu.CompilerParams(dimension_semantics=sems, vmem_limit_bytes=_VMEM_LIMIT)


def _const_spec(shape, grid_rank, buffered):
    """Spec for operands whose block never changes across the grid (weights / biases)."""
    zero = (0,) * len(shape)
    imap = (lambda i: zero) if grid_rank == 1 else (lambda i, j: zero)
    if buffered:
        # Constant index_map => double buffering is pure VMEM waste; single-buffer it.
        return pl.BlockSpec(shape, imap, pipeline_mode=pl.Buffered(1))
    return pl.BlockSpec(shape, imap)


# ---------------- kernel 1: row-tiled matmul + bias (patch embedding == strided conv) --------
def _matmul_bias_kernel(x_ref, w_ref, b_ref, o_ref):
    o_ref[...] = (jnp.dot(x_ref[...], w_ref[...], preferred_element_type=jnp.float32)
                  + b_ref[...]).astype(o_ref.dtype)


def patch_embed(xp, w, b, *, buffered):
    """xp: (M, K) bf16 patch rows; w: (K, D) bf16; b: (1, D) f32 -> (M, D) bf16."""
    M, K = xp.shape
    D = w.shape[1]
    tm = 256 if M >= 256 else 8
    m_pad = _round_up(M, tm)
    if m_pad > M:
        xp = jnp.pad(xp, ((0, m_pad - M), (0, 0)))
    out = pl.pallas_call(
        _matmul_bias_kernel,
        grid=(m_pad // tm,),
        out_shape=jax.ShapeDtypeStruct((m_pad, D), jnp.bfloat16),
        in_specs=[pl.BlockSpec((tm, K), lambda i: (i, 0)),
                  _const_spec((K, D), 1, buffered),
                  _const_spec((1, D), 1, buffered)],
        out_specs=pl.BlockSpec((tm, D), lambda i: (i, 0)),
        compiler_params=_cparams("parallel"),
    )(xp, w, b)
    return out[:M]


# ---------------- kernel 2: fused cls-prepend + pos-add + sequence pad + norm_pre ------------
def _assemble_kernel(tok_ref, cls_ref, pos_ref, g_ref, b_ref, o_ref, *, n_patches):
    s_pad, d = o_ref.shape[1], o_ref.shape[2]
    cls = cls_ref[0].astype(jnp.float32)           # (1, D)
    tok = tok_ref[0].astype(jnp.float32)           # (n_patches, D)
    parts = [cls, tok]
    n_pad = s_pad - 1 - n_patches
    if n_pad > 0:
        parts.append(jnp.zeros((n_pad, d), jnp.float32))
    x = jnp.concatenate(parts, axis=0) + pos_ref[0]
    o_ref[0] = _ln(x, g_ref[...], b_ref[...]).astype(o_ref.dtype)


def assemble_tokens(tok, cls, pos, pre_g, pre_b, *, s_pad, buffered):
    B, n_patches, D = tok.shape
    return pl.pallas_call(
        partial(_assemble_kernel, n_patches=n_patches),
        grid=(B,),
        out_shape=jax.ShapeDtypeStruct((B, s_pad, D), jnp.bfloat16),
        in_specs=[pl.BlockSpec((1, n_patches, D), lambda b: (b, 0, 0)),
                  _const_spec((1, 1, D), 1, buffered),
                  _const_spec((1, s_pad, D), 1, buffered),
                  _const_spec((1, D), 1, buffered),
                  _const_spec((1, D), 1, buffered)],
        out_specs=pl.BlockSpec((1, s_pad, D), lambda b: (b, 0, 0)),
        compiler_params=_cparams("parallel"),
    )(tok, cls, pos, pre_g, pre_b)


# ---------------- kernel 3: fused ViT block, grid = (batch, query-tile) ----------------------
def _vit_block_kernel(x_ref, ln1g, ln1b, wqkv, bqkv, wproj, bproj,
                      ln2g, ln2b, wfc1, bfc1, wfc2, bfc2,
                      o_ref, q_scr, k_scr, v_scr, *, num_heads, tq, n_valid):
    S, D = x_ref.shape[1], x_ref.shape[2]
    hd = D // num_heads
    scale = 1.0 / (hd ** 0.5)
    qt = pl.program_id(1)

    # -- once per image (qt == 0): LN1 + fused qkv projection for the whole padded sequence --
    @pl.when(qt == 0)
    def _():
        x_all = x_ref[0].astype(jnp.float32)                                  # (S, D)
        h = _ln(x_all, ln1g[...], ln1b[...]).astype(jnp.bfloat16)
        qkv = jnp.dot(h, wqkv[...], preferred_element_type=jnp.float32) + bqkv[...]
        for hh in range(num_heads):                                           # head-major scratch
            q_scr[hh] = qkv[:, hh * hd:(hh + 1) * hd].astype(jnp.bfloat16)
            k_scr[hh] = qkv[:, D + hh * hd:D + (hh + 1) * hd].astype(jnp.bfloat16)
            v_scr[hh] = qkv[:, 2 * D + hh * hd:2 * D + (hh + 1) * hd].astype(jnp.bfloat16)

    # -- per query tile: batched-head attention (no per-head transposes / lane concat) --
    row0 = pl.multiple_of(qt * tq, tq)
    x_tile = x_ref[0, pl.ds(row0, tq), :].astype(jnp.float32)                 # (tq, D)
    qh = q_scr[:, pl.ds(row0, tq), :]                                         # (H, tq, hd) bf16
    kh = k_scr[...]                                                           # (H, S, hd)
    vh = v_scr[...]

    s = jnp.einsum('hqd,hkd->hqk', qh, kh,
                   preferred_element_type=jnp.float32) * scale                # (H, tq, S) f32
    if n_valid < S:  # mask padded key positions (static condition)
        kmask = jax.lax.broadcasted_iota(jnp.int32, (1, 1, S), 2) < n_valid
        s = jnp.where(kmask, s, -1e30)
    s = s - jnp.max(s, axis=-1, keepdims=True)
    p = jnp.exp(s)
    p = p * pl.reciprocal(jnp.sum(p, axis=-1, keepdims=True), approx=True)
    o = jnp.einsum('hqk,hkd->hqd', p.astype(jnp.bfloat16), vh,
                   preferred_element_type=jnp.float32)                        # (H, tq, hd) f32

    # output projection accumulated per head (== concat-heads @ Wproj, without the concat);
    # fold the projection bias into the accumulator init to save one vector add.
    acc = jnp.broadcast_to(bproj[...], (tq, D)).astype(jnp.float32)
    for hh in range(num_heads):
        acc = acc + jnp.dot(o[hh].astype(jnp.bfloat16),
                            wproj[hh * hd:(hh + 1) * hd, :],
                            preferred_element_type=jnp.float32)
    x1 = x_tile + acc                                                         # residual (f32)

    # -- MLP (pre-norm) --
    h2 = _ln(x1, ln2g[...], ln2b[...]).astype(jnp.bfloat16)
    h2 = jnp.dot(h2, wfc1[...], preferred_element_type=jnp.float32) + bfc1[...]
    h2 = jax.nn.gelu(h2, approximate=False).astype(jnp.bfloat16)              # erf GELU (torch default)
    h2 = jnp.dot(h2, wfc2[...], preferred_element_type=jnp.float32) + bfc2[...]

    o_ref[0] = (x1 + h2).astype(o_ref.dtype)


def vit_block(x, p, *, num_heads, tq, n_valid, buffered):
    B, S, D = x.shape
    Hm = p["fc1_w"].shape[1]
    hd = D // num_heads

    def cs(shape):
        return _const_spec(shape, 2, buffered)

    return pl.pallas_call(
        partial(_vit_block_kernel, num_heads=num_heads, tq=tq, n_valid=n_valid),
        grid=(B, S // tq),
        out_shape=jax.ShapeDtypeStruct((B, S, D), jnp.bfloat16),
        in_specs=[
            pl.BlockSpec((1, S, D), lambda b, q: (b, 0, 0)),   # full sequence, constant in q
            cs((1, D)), cs((1, D)),
            cs((D, 3 * D)), cs((1, 3 * D)),
            cs((D, D)), cs((1, D)),
            cs((1, D)), cs((1, D)),
            cs((D, Hm)), cs((1, Hm)),
            cs((Hm, D)), cs((1, D)),
        ],
        out_specs=pl.BlockSpec((1, tq, D), lambda b, q: (b, q, 0)),
        scratch_shapes=[pltpu.VMEM((num_heads, S, hd), jnp.bfloat16)] * 3,
        compiler_params=_cparams("parallel", "arbitrary"),
    )(x, p["ln1_g"], p["ln1_b"], p["qkv_w"], p["qkv_b"], p["proj_w"], p["proj_b"],
      p["ln2_g"], p["ln2_b"], p["fc1_w"], p["fc1_b"], p["fc2_w"], p["fc2_b"])


# ---------------- kernel 4: batch-tiled avg-pool over patch tokens + fc_norm -----------------
def _pool_norm_kernel(x_ref, g_ref, b_ref, o_ref, *, count):
    x = x_ref[0].astype(jnp.float32)                                   # (S, D)
    ridx = jax.lax.broadcasted_iota(jnp.int32, (x.shape[0], 1), 0)
    sel = jnp.logical_and(ridx >= 1, ridx < 1 + count).astype(jnp.float32)   # skip cls + pads
    pooled = jnp.sum(x * sel, axis=0, keepdims=True) * (1.0 / count)   # true-patch-count mean
    o_ref[0] = _ln(pooled, g_ref[...], b_ref[...]).astype(o_ref.dtype)


def pool_norm(x, g, b, *, count, buffered):
    B, S, D = x.shape
    out = pl.pallas_call(
        partial(_pool_norm_kernel, count=count),
        grid=(B,),
        out_shape=jax.ShapeDtypeStruct((B, 1, D), jnp.float32),
        in_specs=[pl.BlockSpec((1, S, D), lambda bb: (bb, 0, 0)),
                  _const_spec((1, D), 1, buffered),
                  _const_spec((1, D), 1, buffered)],
        out_specs=pl.BlockSpec((1, 1, D), lambda bb: (bb, 0, 0)),
        compiler_params=_cparams("parallel"),
    )(x, g, b)
    return out[:, 0, :]


# ---------------- parameter init (deterministic, synthetic; matmul weights stored bf16) ------
def init_params(key, *, in_chans, patch, img, dim, depth, heads, mlp):
    del heads
    n_patches = (img // patch) ** 2
    seq = n_patches + 1
    keys = jax.random.split(key, 4 + depth)
    std = 0.02

    def nrm(k, shape, dtype=jnp.float32):
        return (std * jax.random.normal(k, shape, jnp.float32)).astype(dtype)

    params = {
        "patch_w": nrm(keys[0], (in_chans * patch * patch, dim), jnp.bfloat16),
        "patch_b": jnp.zeros((1, dim), jnp.float32),
        "cls": nrm(keys[1], (1, 1, dim)),
        "pos": nrm(keys[2], (1, seq, dim)),
        "pre_g": jnp.ones((1, dim), jnp.float32), "pre_b": jnp.zeros((1, dim), jnp.float32),
        "fcn_g": jnp.ones((1, dim), jnp.float32), "fcn_b": jnp.zeros((1, dim), jnp.float32),
        "blocks": [],
    }
    for i in range(depth):
        bk = jax.random.split(keys[4 + i], 4)
        params["blocks"].append({
            "ln1_g": jnp.ones((1, dim), jnp.float32), "ln1_b": jnp.zeros((1, dim), jnp.float32),
            "qkv_w": nrm(bk[0], (dim, 3 * dim), jnp.bfloat16),
            "qkv_b": jnp.zeros((1, 3 * dim), jnp.float32),
            "proj_w": nrm(bk[1], (dim, dim), jnp.bfloat16),
            "proj_b": jnp.zeros((1, dim), jnp.float32),
            "ln2_g": jnp.ones((1, dim), jnp.float32), "ln2_b": jnp.zeros((1, dim), jnp.float32),
            "fc1_w": nrm(bk[2], (dim, mlp), jnp.bfloat16),
            "fc1_b": jnp.zeros((1, mlp), jnp.float32),
            "fc2_w": nrm(bk[3], (mlp, dim), jnp.bfloat16),
            "fc2_b": jnp.zeros((1, dim), jnp.float32),
        })
    return params


# ---------------- full forward (glue in plain JAX, hot paths in Pallas) ----------------------
def image_encoder_forward(x, params, *, patch, heads, buffered_weights=True):
    B, C, H, W = x.shape
    nH, nW = H // patch, W // patch
    n_patches = nH * nW
    D = params["patch_w"].shape[1]
    s_real = n_patches + 1
    tq = 128 if s_real >= 128 else 8               # query tile (128 at real ViT-B scale)
    s_pad = _round_up(s_real, tq)                  # lane/sublane-friendly padded sequence

    # Patchify NCHW so each row matches Conv2d(kernel=p, stride=p) weight layout (C, p, p).
    xp = x.reshape(B, C, nH, patch, nW, patch)
    xp = xp.transpose(0, 2, 4, 1, 3, 5).reshape(B * n_patches, C * patch * patch)
    tok = patch_embed(xp.astype(jnp.bfloat16), params["patch_w"], params["patch_b"],
                      buffered=buffered_weights).reshape(B, n_patches, D)

    pos = params["pos"]
    if s_pad > s_real:
        pos = jnp.pad(pos, ((0, 0), (0, s_pad - s_real), (0, 0)))

    # fused: prepend cls, add pos, pad sequence, norm_pre (CLIP ViT pre_norm=True)
    xt = assemble_tokens(tok, params["cls"], pos, params["pre_g"], params["pre_b"],
                         s_pad=s_pad, buffered=buffered_weights)

    for bp in params["blocks"]:
        xt = vit_block(xt, bp, num_heads=heads, tq=tq, n_valid=s_real,
                       buffered=buffered_weights)

    # timm: global_pool='avg' -> final norm Identity, mean over patch tokens (skip cls/pads),
    # then fc_norm (LayerNorm); head is Identity since num_classes=0.
    return pool_norm(xt, params["fcn_g"], params["fcn_b"], count=n_patches,
                     buffered=buffered_weights)


if __name__ == "__main__":
    # Scaled-down ViT config (real model: img=224, patch=16, dim=768, depth=12, heads=12).
    B, C, IMG, PATCH = 2, 3, 48, 16
    DIM, DEPTH, HEADS, MLP = 128, 2, 4, 512

    # TODO(synk): pretrained CLIP weights cannot be loaded here; parameters are synthetic.
    key = jax.random.PRNGKey(0)
    k_x, k_p = jax.random.split(key)
    x = jax.random.normal(k_x, (B, C, IMG, IMG), dtype=jnp.float32)
    params = init_params(k_p, in_chans=C, patch=PATCH, img=IMG,
                         dim=DIM, depth=DEPTH, heads=HEADS, mlp=MLP)

    try:
        out = jax.block_until_ready(
            image_encoder_forward(x, params, patch=PATCH, heads=HEADS, buffered_weights=True))
    except Exception:
        # Fallback if pl.Buffered(1) single-buffering is unsupported on this toolchain.
        out = jax.block_until_ready(
            image_encoder_forward(x, params, patch=PATCH, heads=HEADS, buffered_weights=False))

    assert out.shape == (B, DIM), out.shape
    assert bool(jnp.all(jnp.isfinite(out)))
    print("KERNEL_OK")
</pallas_src>

<mosaic_0001>
module attributes {stable_mosaic.version = 11 : i64} {
  func.func @_matmul_bias_kernel(%arg0: i32, %arg1: memref<8x768xbf16, #tpu.memory_space<vmem>>, %arg2: memref<768x128xbf16, #tpu.memory_space<vmem>>, %arg3: memref<1x128xf32, #tpu.memory_space<vmem>>, %arg4: memref<8x128xbf16, #tpu.memory_space<vmem>>) attributes {dimension_semantics = [#tpu.dimension_semantics<parallel>], iteration_bounds = array<i64: 3>, scalar_prefetch = 0 : i64, scratch_operands = 0 : i64, tpu.core_type = #tpu.core_type<tc>, window_params = [{transform_indices = @transform_0, window_bounds = array<i64: 8, 768>}, {pipeline_mode = #tpu.pipeline_mode<synchronous>, transform_indices = @transform_1, window_bounds = array<i64: 768, 128>}, {pipeline_mode = #tpu.pipeline_mode<synchronous>, transform_indices = @transform_2, window_bounds = array<i64: 1, 128>}, {transform_indices = @transform_3, window_bounds = array<i64: 8, 128>}]} {
    %c0 = arith.constant 0 : index
    %c0_0 = arith.constant 0 : index
    %0 = vector.load %arg1[%c0, %c0_0] : memref<8x768xbf16, #tpu.memory_space<vmem>>, vector<8x768xbf16>
    %c0_1 = arith.constant 0 : index
    %c0_2 = arith.constant 0 : index
    %1 = vector.load %arg2[%c0_1, %c0_2] : memref<768x128xbf16, #tpu.memory_space<vmem>>, vector<768x128xbf16>
    %cst = arith.constant dense<0.000000e+00> : vector<8x128xf32>
    %2 = tpu.matmul %0, %1, %cst {dimension_numbers = #tpu.dot_dimension_numbers<[1], [0], [0], [1], [0, 0, 1, 1], [], []>} : vector<8x768xbf16>, vector<768x128xbf16>, vector<8x128xf32> -> vector<8x128xf32>
    %c0_3 = arith.constant 0 : index
    %c0_4 = arith.constant 0 : index
    %3 = vector.load %arg3[%c0_3, %c0_4] : memref<1x128xf32, #tpu.memory_space<vmem>>, vector<1x128xf32>
    %4 = vector.broadcast %3 : vector<1x128xf32> to vector<8x128xf32>
    %5 = arith.addf %2, %4 : vector<8x128xf32>
    %6 = arith.truncf %5 : vector<8x128xf32> to vector<8x128xbf16>
    %c0_5 = arith.constant 0 : index
    %c0_6 = arith.constant 0 : index
    %7 = vector.load %arg4[%c0_5, %c0_6] : memref<8x128xbf16, #tpu.memory_space<vmem>>, vector<8x128xbf16>
    tpu.vector_store %arg4[%c0_5, %c0_6], %6 {strides = array<i32>} : memref<8x128xbf16, #tpu.memory_space<vmem>>, vector<8x128xbf16>,
    return
  }
  func.func @transform_0(%arg0: i32) -> (i32, i32) {
    %c0_i32 = arith.constant 0 : i32
    %c0_i32_0 = arith.constant 0 : i32
    return %arg0, %c0_i32 : i32, i32
  }
  func.func @transform_1(%arg0: i32) -> (i32, i32) {
    %c0_i32 = arith.constant 0 : i32
    %c0_i32_0 = arith.constant 0 : i32
    %c0_i32_1 = arith.constant 0 : i32
    return %c0_i32, %c0_i32_0 : i32, i32
  }
  func.func @transform_2(%arg0: i32) -> (i32, i32) {
    %c0_i32 = arith.constant 0 : i32
    %c0_i32_0 = arith.constant 0 : i32
    %c0_i32_1 = arith.constant 0 : i32
    return %c0_i32, %c0_i32_0 : i32, i32
  }
  func.func @transform_3(%arg0: i32) -> (i32, i32) {
    %c0_i32 = arith.constant 0 : i32
    %c0_i32_0 = arith.constant 0 : i32
    return %arg0, %c0_i32 : i32, i32
  }
}

module attributes {stable_mosaic.version = 11 : i64} {
  func.func @_matmul_bias_kernel(%arg0: i32, %arg1: memref<8x768xbf16, #tpu.memory_space<vmem>>, %arg2: memref<768x128xbf16, #tpu.memory_space<vmem>>, %arg3: memref<1x128xf32, #tpu.memory_space<vmem>>, %arg4: memref<8x128xbf16, #tpu.memory_space<vmem>>) attributes {dimension_semantics = [#tpu.dimension_semantics<parallel>], iteration_bounds = array<i64: 3>, scalar_prefetch = 0 : i64, scratch_operands = 0 : i64, tpu.core_type = #tpu.core_type<tc>, window_params = [{transform_indices = @transform_0, window_bounds = array<i64: 8, 768>}, {pipeline_mode = #tpu.pipeline_mode<synchronous>, transform_indices = @transform_1, window_bounds = array<i64: 768, 128>}, {pipeline_mode = #tpu.pipeline_mode<synchronous>, transform_indices = @transform_2, window_bounds = array<i64: 1, 128>}, {transform_indices = @transform_3, window_bounds = array<i64: 8, 128>}]} {
    %c0 = arith.constant 0 : index
    %c0_0 = arith.constant 0 : index
    %0 = vector.load %arg1[%c0, %c0_0] : memref<8x768xbf16, #tpu.memory_space<vmem>>, vector<8x768xbf16>
    %c0_1 = arith.constant 0 : index
    %c0_2 = arith.constant 0 : index
    %1 = vector.load %arg2[%c0_1, %c0_2] : memref<768x128xbf16, #tpu.memory_space<vmem>>, vector<768x128xbf16>
    %cst = arith.constant dense<0.000000e+00> : vector<8x128xf32>
    %2 = tpu.matmul %0, %1, %cst {dimension_numbers = #tpu.dot_dimension_numbers<[1], [0], [0], [1], [0, 0, 1, 1], [], []>} : vector<8x768xbf16>, vector<768x128xbf16>, vector<8x128xf32> -> vector<8x128xf32>
    %c0_3 = arith.constant 0 : index
    %c0_4 = arith.constant 0 : index
    %3 = vector.load %arg3[%c0_3, %c0_4] : memref<1x128xf32, #tpu.memory_space<vmem>>, vector<1x128xf32>
    %4 = vector.broadcast %3 : vector<1x128xf32> to vector<8x128xf32>
    %5 = arith.addf %2, %4 : vector<8x128xf32>
    %6 = arith.truncf %5 : vector<8x128xf32> to vector<8x128xbf16>
    %c0_5 = arith.constant 0 : index
    %c0_6 = arith.constant 0 : index
    %7 = vector.load %arg4[%c0_5, %c0_6] : memref<8x128xbf16, #tpu.memory_space<vmem>>, vector<8x128xbf16>
    tpu.vector_store %arg4[%c0_5, %c0_6], %6 {strides = array<i32>} : memref<8x128xbf16, #tpu.memory_space<vmem>>, vector<8x128xbf16>,
    return
  }
  func.func @transform_0(%arg0: i32) -> (i32, i32) {
    %c0_i32 = arith.constant 0 : i32
    %c0_i32_0 = arith.constant 0 : i32
    return %arg0, %c0_i32 : i32, i32
  }
  func.func @transform_1(%arg0: i32) -> (i32, i32) {
    %c0_i32 = arith.constant 0 : i32
    %c0_i32_0 = arith.constant 0 : i32
    %c0_i32_1 = arith.constant 0 : i32
    return %c0_i32, %c0_i32_0 : i32, i32
  }
  func.func @transform_2(%arg0: i32) -> (i32, i32) {
    %c0_i32 = arith.constant 0 : i32
    %c0_i32_0 = arith.constant 0 : i32
    %c0_i32_1 = arith.constant 0 : i32
    return %c0_i32, %c0_i32_0 : i32, i32
  }
  func.func @transform_3(%arg0: i32) -> (i32, i32) {
    %c0_i32 = arith.constant 0 : i32
    %c0_i32_0 = arith.constant 0 : i32
    return %arg0, %c0_i32 : i32, i32
  }
}

</mosaic_0001>

<bundles_post_ra>
// kernel: tpu_custom_call.1
= control target key start
LH: loop header
LB: loop body
LE: loop exit
PB: predicated region body
PF: predicated region fallthrough
CT: control target
= control target key end

     0   :  { %8 = vsyncpa [#allocation3], 0  ;;  %s1393_s0 = inlined_call_operand.hbm [shape: bf16[24,768], index: 0, kind: input, shape index: {}]   ;;  %s1394_s1 = inlined_call_operand.hbm [shape: bf16[768,128], index: 1, kind: input, shape index: {}]   ;;  %s1395_s2 = inlined_call_operand.vmem [shape: f32[1,128], index: 2, kind: input, shape index: {}]   ;;  %s1396_s3 = inlined_call_operand.hbm [shape: bf16[24,128], index: 3, kind: output, shape index: {}]  }
   0x1   :  { %10 = vsyncpa [#allocation3 + $0x1], 0 }
   0x2   :  { %11 = vsyncpa [#allocation6], 0 }
   0x3   :  { %12 = vsyncpa [#allocation4], 0 }
   0x4   :  { %14 = vsyncpa [#allocation4 + $0x1], 0  ;;  %s1232_s12 = smov 0   ;;  %s1234_s13 = smov 0  }
   0x5   :  { %s1236_s14 = smov 0   ;;  %s1238_s15 = smov 0  }
   0x6 LB: > { %s1253_s16 = sadd.s32 4294967295, %s1205_s15   ;;  %s834_s17 = sadd.s32 4294967294, %s1205_s15   ;;  %s1205_s15 = sphi %s1238_s15, %s1417_s15   ;;  %s1201_s14 = sphi %s1236_s14, %s1416_s14   ;;  %s1197_s13 = sphi %s1234_s13, %s1415_s13   ;;  %s1193_s12 = sphi %s1232_s12, %s1414_s12  }
   0x7   : > { %p40_p0 = scmp.ne.s32.totalorder %s1197_s13, %s1193_s12  ;;  %p1397_p1 = scmp.eq.s32.totalorder %s1253_s16, 0 }
   0x8   : > { %p112_p3 = scmp.eq.s32.totalorder %s834_s17, 2  ;;  %p835_p5 = scmp.ge.s32.totalorder %s1205_s15, 1 }
   0x9   : > { %p1262_p4 = por %p1397_p1, %p40_p0  ;;  %p119_p7 = scmp.lt.s32.totalorder %s1205_s15, 4 }
   0xa   : > { %p1267_p6 = por %p112_p3, %p40_p0  ;;  %s1207_s21 = smov [#allocation5]  }
   0xb   : > { %s1401_s18 = scalar_select %p1262_p4, 1, 0 }
   0xc   : > { %s1402_s19 = scalar_select %p1267_p6, 1, 0 }
   0xd   : > { %p1272_p8 = pnand %p835_p5, %p119_p7  ;;  %s131_s22 = sshll.u32 %s1207_s21, 4  ;;  %s132_s22 = int_to_ptr.vmem [resolvable:$true] %s131_s22 }
   0xe   : > { %s1285_s24 = sadd.s32 1, %s1205_s15   ;;  %s27_s25 = sadd.s32 1, %s1201_s14 }
   0xf   : > { %s1403_s20 = scalar_select %p1272_p8, 1, 0 }
  0x10   : > { %p978_p9 = pneg %p1272_p8  ;;  %s24_s26 = ssub.s32 %s1205_s15, %s1285_s24 }
  0x11   : > { %s1094_s27 = scalar_lea.vmem %s132_s22, 6144  ;;  %p1102_p3 = scmp.lt.s32.totalorder %s132_s22, %s132_s22 }
  0x12   : > { %p1280_p10 = pnand %p978_p9, %p1397_p1  ;;  %p1095_p12 = scmp.ne.s32.totalorder %s132_s22, %s1094_s27 }
  0x13   : > { %p1103_p5 = scmp.lt.s32.totalorder %s1094_s27, %s1094_s27 }
  0x14   : > { %p1085_p11 = pneg %p1280_p10 }
  0x15   : > { %p1104_p7 = por %p1103_p5, %p1102_p3 }
  0x16   : > { %p1097_p13 = pnand %p1095_p12, %p1085_p11 }
  0x18   : > { %p1098_p0 = pneg %p1097_p13 }
  0x1a   : > { %p1105_p2 = pnand %p1104_p7, %p1098_p0 }
  0x1c   : > { %1108 = shalt.err (!%p1105_p2)
}
  0x1d   : > { %s1208_s28 = smov 64   ;;  %s1209_s29 = smov 4  }
  0x1e   : > { %981 = dma.hbm_to_vmem [thread:$0]  (!%p1280_p10), %s1394_s1, 6144, %s132_s22, [#allocation6], %s1208_s28, %s1208_s28, %s1209_s29  }
  0x1f   : > { %p25_p9 = scmp.eq.s32.totalorder %s24_s26, 0  ;;  %p34_p11 = scmp.ne.s32.totalorder %s1201_s14, %s1197_s13 }
  0x20   : > { %p35_p12 = scmp.eq.s32.totalorder %s1205_s15, 0  ;;  %p991_p2 = scmp.lt.s32.totalorder %s1205_s15, 3 }
  0x21   : > { %s1302_s5 = scalar_select %p25_p9, %s1201_s14, %s27_s25  }
  0x22   : > { %p36_p13 = por %p35_p12, %p34_p11  ;;  %p1405_p0 = scmp.eq.s32.totalorder %s1253_s16, 2 }
  0x23   : > { %s148_s7 = sand.u32 1, %s1201_s14   ;;  %s968_s8 = smul.u32 384, %s1205_s15 }
  0x24   : > { %p1306_p3 = por %p1405_p0, %p34_p11  ;;  %s967_s9 = smul.u32 24, %s148_s7 }
  0x25   : > { %p1312_p5 = pnand %p991_p2, %p36_p13  ;;  %s1319_s21 = scalar_lea.hbm %s1393_s0, %s968_s8 }
  0x26   : > { %s1406_s6 = scalar_select %p1306_p3, 1, 0 }
  0x27   : > { %s152_s22 = scalar_lea.vmem [#allocation2], %s967_s9  ;;  %s149_s25 = scalar_lea.sflag [#allocation3], %s148_s7 }
  0x28   : > { %s160_s23 = sshll.u32 %s152_s22, 4  ;;  %s1109_s26 = scalar_lea.hbm %s1319_s21, 384  ;;  %s161_s23 = int_to_ptr.vmem [resolvable:$true] %s160_s23 }
  0x29   : > { %p1110_p10 = scmp.ne.s32.totalorder %s1319_s21, %s1109_s26  ;;  %p1111_p7 = pneg %p1312_p5 }
  0x2a   : > { %s1114_s29 = scalar_lea.hbm %s1393_s0, 1152  ;;  %p1115_p12 = scmp.lt.s32.totalorder %s1319_s21, %s1393_s0 }
  0x2b   : > { %p1112_p9 = pnand %p1111_p7, %p1110_p10  ;;  %p1116_p2 = scmp.lt.s32.totalorder %s1114_s29, %s1109_s26 }
  0x2d   : > { %p1113_p11 = pneg %p1112_p9  ;;  %p1117_p13 = por %p1116_p2, %p1115_p12 }
  0x2f   : > { %p1118_p0 = pnand %p1117_p13, %p1113_p11 }
  0x31   : > { %1121 = shalt.err (!%p1118_p0)
}
  0x32   : > { %s1122_s8 = scalar_lea.vmem %s161_s23, 384  ;;  %s1210_s7 = smov [#allocation2]  }
  0x33   : > { %p1123_p1 = scmp.ne.s32.totalorder %s161_s23, %s1122_s8  ;;  %s1127_s9 = sshll.u32 %s1210_s7, 4  ;;  %s1128_s9 = int_to_ptr.vmem [resolvable:$false] %s1127_s9 }
  0x34   : > { %s1129_s11 = scalar_lea.vmem %s1128_s9, 768  ;;  %p1130_p10 = scmp.lt.s32.totalorder %s161_s23, %s1128_s9 }
  0x35   : > { %p1125_p6 = pnand %p1123_p1, %p1111_p7  ;;  %p1131_p9 = scmp.lt.s32.totalorder %s1129_s11, %s1122_s8 }
  0x37   : > { %p1126_p3 = pneg %p1125_p6  ;;  %p1132_p4 = por %p1131_p9, %p1130_p10 }
  0x39   : > { %p1133_p8 = pnand %p1132_p4, %p1126_p3 }
  0x3b   : > { %1136 = shalt.err (!%p1133_p8)
}
  0x3c   : > { %985 = dma.hbm_to_vmem [thread:$0]  (!%p1312_p5), %s1319_s21, 384, %s161_s23, %s149_s25  }
  0x3d   : > { %p1408_p11 = scmp.ne.s32.totalorder %s1403_s20, 0 }
  0x3e   : > { %s1338_s17 = sand.u32 (!%p1408_p11), 1, %s1197_s13   ;;  %p1409_p1 = scmp.ne.s32.totalorder (!%p1408_p11), %s1401_s18, 0 }
  0x3f   : > { %169 = sbr.rel (%p1408_p11) target bundleno = 351 (0x15f), region = 32  ;;  %s172_s26 = scalar_lea.sflag (!%p1408_p11), [#allocation3], %s1338_s17 }
  0x40   : > { %s969_s22 = smul.u32 (!%p1408_p11), 24, %s1338_s17 }
  0x42   : > { %s1342_s27 = scalar_lea.vmem (!%p1408_p11), [#allocation2], %s969_s22 }
  0x44   : > { %1180 = dma.done.wait (%p1409_p1), %s172_s26, 384  }
  0x45   : > { %1182 = vsyncadd (%p1409_p1), %s172_s26, 4294966912  ;;  %p1410_p4 = scmp.eq.s32.totalorder %s1253_s16, 0 }
  0x47   : > { %1184 = dma.done.wait (%p1410_p4), [#allocation6], 6144   ;;  %p1411_p6 = pmov %p1410_p4 }
  0x48   : > { %v1029_v0 = vld [vmem:[#allocation5 + $0x78] sm:$0xff]   ;;  %v1033_v4 = vld [vmem:[#allocation5 + $0x70] sm:$0xff]   ;;  %v1037_v8 = vld [vmem:[#allocation5 + $0x68] sm:$0xff]   ;;  %s841_s10 = sshll.u32 %s1338_s17, 2  ;;  %s898_s21 = sshll.u32 %s1253_s16, 6 }
  0x49   : > { %1186 = vsyncadd (%p1411_p6), [#allocation6], 4294961152  ;;  %v1030_v1 = vld [vmem:[#allocation5 + $0x38] sm:$0xff]   ;;  %901 = vmatprep.subr.bf16.mxu0 %v1029_v0  ;;  %v1034_v5 = vld [vmem:[#allocation5 + $0x30] sm:$0xff]   ;;  %s201_s23 = scalar_lea.vmem [#allocation7], %s841_s10  ;;  %s752_s30 = scalar_lea.hbm %s1396_s3, %s898_s21 }
  0x4a   : > { %v1031_v2 = vld [vmem:[#allocation5 + $0xf8] sm:$0xff]   ;;  %902 = vmatpush3.bf16.msra.mxu0 %v1030_v1  ;;  %v1035_v6 = vld [vmem:[#allocation5 + $0xf0] sm:$0xff]   ;;  %v1038_v9 = vld [vmem:[#allocation5 + $0x28] sm:$0xff]   ;;  %s754_s25 = sshll.u32 %s201_s23, 4  ;;  %s741_s4 = scalar_lea.sflag [#allocation4], %s1338_s17  ;;  %s755_s25 = int_to_ptr.vmem [resolvable:$true] %s754_s25 }
  0x4b   : > { %v1032_v3 = vld [vmem:[#allocation5 + $0xb8] sm:$0xff]   ;;  %923 = vmatprep.subr.bf16.mxu1 %v1031_v2  ;;  %903 = vmatprep.subr.bf16.mxu0 %v1033_v4  ;;  %v1036_v7 = vld [vmem:[#allocation5 + $0xb0] sm:$0xff]   ;;  %v1039_v10 = vld [vmem:[#allocation5 + $0xe8] sm:$0xff]   ;;  %s1137_s8 = scalar_lea.vmem %s755_s25, 64  ;;  %p1412_p3 = scmp.ne.s32.totalorder %s1406_s6, 0 }
  0x4c   : > { %924 = vmatpush3.bf16.msra.mxu1 %v1032_v3  ;;  %v1040_v11 = vld [vmem:[#allocation5 + $0xa8] sm:$0xff]   ;;  %v1041_v12 = vld [vmem:[#allocation5 + $0x60] sm:$0xff]   ;;  %v1045_v16 = vld [vmem:[#allocation5 + $0x58] sm:$0xff]   ;;  %p1138_p8 = scmp.ne.s32.totalorder %s755_s25, %s1137_s8  ;;  %s1211_s7 = smov [#allocation7]  }
  0x4d   : > { %925 = vmatprep.subr.bf16.mxu1 %v1035_v6  ;;  %v1042_v13 = vld [vmem:[#allocation5 + $0x20] sm:$0xff]   ;;  %v1046_v17 = vld [vmem:[#allocation5 + $0x18] sm:$0xff]   ;;  %v1049_v20 = vld [vmem:[#allocation5 + $0x50] sm:$0xff]   ;;  %s1141_s9 = sshll.u32 %s1211_s7, 4  ;;  %s1142_s9 = int_to_ptr.vmem [resolvable:$false] %s1141_s9 }
  0x4e   : > { %904 = vmatpush3.bf16.msra.mxu0 %v1034_v5  ;;  %v1043_v14 = vld [vmem:[#allocation5 + $0xe0] sm:$0xff]   ;;  %v1047_v18 = vld [vmem:[#allocation5 + $0xd8] sm:$0xff]   ;;  %v1050_v21 = vld [vmem:[#allocation5 + $0x10] sm:$0xff]   ;;  %p1139_p5 = pnand %p1138_p8, %p1412_p3  ;;  %s1143_s16 = scalar_lea.vmem %s1142_s9, 128 }
  0x4f   : > { %905 = vmatprep.subr.bf16.mxu0 %v1037_v8  ;;  %v1044_v15 = vld [vmem:[#allocation5 + $0xa0] sm:$0xff]   ;;  %v1048_v19 = vld [vmem:[#allocation5 + $0x98] sm:$0xff]   ;;  %v1051_v22 = vld [vmem:[#allocation5 + $0xd0] sm:$0xff]   ;;  %p1144_p12 = scmp.lt.s32.totalorder %s755_s25, %s1142_s9  ;;  %p1145_p2 = scmp.lt.s32.totalorder %s1143_s16, %s1137_s8 }
  0x50   : > { %926 = vmatpush3.bf16.msra.mxu1 %v1036_v7  ;;  %v1052_v23 = vld [vmem:[#allocation5 + $0x90] sm:$0xff]   ;;  %v1053_v24 = vld [vmem:[#allocation5 + $0x48] sm:$0xff]   ;;  %v1057_v28 = vld [vmem:[#allocation5 + $0x40] sm:$0xff]   ;;  %p1140_p7 = pneg %p1139_p5 }
  0x51   : > { %927 = vmatprep.subr.bf16.mxu1 %v1039_v10  ;;  %v1054_v25 = vld [vmem:[#allocation5 + $0x8] sm:$0xff]   ;;  %v1058_v29 = vld [vmem:[#allocation5] sm:$0xff]   ;;  %v1063_v35 = vld [vmem:[#allocation5 + $0x178] sm:$0xff]   ;;  %p1146_p13 = por %p1145_p2, %p1144_p12 }
  0x52   : > { %906 = vmatpush3.bf16.msra.mxu0 %v1038_v9  ;;  %v1055_v26 = vld [vmem:[#allocation5 + $0xc8] sm:$0xff]   ;;  %v1059_v30 = vld [vmem:[#allocation5 + $0xc0] sm:$0xff]   ;;  %v204_v36 = vld [vmem:[%s1342_s27 + $0x8] sm:$0xff] }
  0x53   : > { %907 = vmatprep.subr.bf16.mxu0 %v1041_v12  ;;  %v1056_v27 = vld [vmem:[#allocation5 + $0x88] sm:$0xff]   ;;  %v1062_v34 = vld [vmem:[#allocation5 + $0x80] sm:$0xff]   ;;  %v845_v37 = vcombine.low %v204_v36, %v204_v36  ;;  %v846_v38 = vcombine.high %v204_v36, %v204_v36  ;;  %v1066_v39 = vld [vmem:[#allocation5 + $0x138] sm:$0xff]   ;;  %p1147_p0 = pnand %p1146_p13, %p1140_p7 }
  0x54   : > { %928 = vmatpush3.bf16.msra.mxu1 %v1040_v11  ;;  %v203_v31 = vld [vmem:[%s1342_s27] sm:$0xff]  ;;  %v1071_v44 = vld [vmem:[#allocation5 + $0x160] sm:$0xff]   ;;  %v1073_v46 = vld [vmem:[#allocation5 + $0x158] sm:$0xff]  }
  0x55   : > { %929 = vmatprep.subr.bf16.mxu1 %v1043_v14  ;;  %v843_v32 = vcombine.low %v203_v31, %v203_v31  ;;  %v844_v33 = vcombine.high %v203_v31, %v203_v31  ;;  %v1067_v40 = vld [vmem:[#allocation5 + $0x170] sm:$0xff]   ;;  %690 = vmatprep.mubr.bf16.mxu1 %v846_v38  ;;  %v1069_v42 = vld [vmem:[#allocation5 + $0x168] sm:$0xff]   ;;  %v1072_v45 = vld [vmem:[#allocation5 + $0x120] sm:$0xff]  }
  0x56   : > { %908 = vmatpush3.bf16.msra.mxu0 %v1042_v13  ;;  %v1068_v41 = vld [vmem:[#allocation5 + $0x130] sm:$0xff]   ;;  %v1070_v43 = vld [vmem:[#allocation5 + $0x128] sm:$0xff]   ;;  %v1074_v47 = vld [vmem:[#allocation5 + $0x118] sm:$0xff]  }
  0x57   : > { %909 = vmatprep.subr.bf16.mxu0 %v1045_v16  ;;  %650 = vmatprep.mubr.bf16.mxu0 %v844_v33  ;;  %v205_v48 = vld [vmem:[%s1342_s27 + $0x10] sm:$0xff]  ;;  %v1075_v49 = vld [vmem:[#allocation5 + $0x150] sm:$0xff]   ;;  %v1077_v52 = vld [vmem:[#allocation5 + $0x148] sm:$0xff]  }
  0x58   : > { %930 = vmatpush3.bf16.msra.mxu1 %v1044_v15  ;;  %v848_v50 = vcombine.high %v205_v48, %v205_v48  ;;  %v1076_v51 = vld [vmem:[#allocation5 + $0x110] sm:$0xff]   ;;  %v1078_v53 = vld [vmem:[#allocation5 + $0x108] sm:$0xff]   ;;  %v1079_v54 = vld [vmem:[#allocation5 + $0x140] sm:$0xff]   ;;  %v847_v56 = vcombine.low %v205_v48, %v205_v48 }
  0x59   : > { %931 = vmatprep.subr.bf16.mxu1 %v1047_v18  ;;  %v1080_v55 = vld [vmem:[#allocation5 + $0x100] sm:$0xff]   ;;  %v842_v2 = vld [vmem:[%s1395_s2] ss:$0 sm:$0xff] }
  0x5a   : > { %910 = vmatpush3.bf16.msra.mxu0 %v1046_v17 }
  0x5b   : > { %911 = vmatprep.subr.bf16.mxu0 %v1049_v20 }
  0x5c   : > { %932 = vmatpush3.bf16.msra.mxu1 %v1048_v19 }
  0x5d   : > { %933 = vmatprep.subr.bf16.mxu1 %v1051_v22 }
  0x5e   : > { %912 = vmatpush3.bf16.msra.mxu0 %v1050_v21 }
  0x5f   : > { %913 = vmatprep.subr.bf16.mxu0 %v1053_v24 }
  0x60   : > { %934 = vmatpush3.bf16.msra.mxu1 %v1052_v23 }
  0x61   : > { %935 = vmatprep.subr.bf16.mxu1 %v1055_v26 }
  0x62   : > { %914 = vmatpush3.bf16.msra.mxu0 %v1054_v25 }
  0x63   : > { %915 = vmatprep.subr.bf16.mxu0 %v1057_v28 }
  0x64   : > { %936 = vmatpush3.bf16.msra.mxu1 %v1056_v27 }
  0x65   : > { %937 = vmatprep.subr.bf16.mxu1 %v1059_v30 }
  0x66   : > { %916 = vmatpush3.bf16.msra.mxu0 %v1058_v29 }
  0x67   : > { %945 = vmatprep.subr.bf16.mxu0 %v1063_v35 }
  0x68   : > { %938 = vmatpush3.bf16.msra.mxu1 %v1062_v34 }
  0x69   : > { %651 = vmatmul.mubr.bf16.vlgmr.msra.gmra.mxu0 %v843_v32 }
  0x6a   : > { %946 = vmatpush3.bf16.msra.mxu0 %v1066_v39  ;;  %730 = vmatprep.mubr.bf16.mxu0 %v848_v50 }
  0x6b   : > { %691 = vmatmul.mubr.bf16.vlgmr.msra.gmra.mxu1 %v845_v37  ;;  %947 = vmatprep.subr.bf16.mxu0 %v1067_v40 }
  0x6e   : > { %948 = vmatpush3.bf16.msra.mxu0 %v1068_v41 }
  0x6f   : > { %949 = vmatprep.subr.bf16.mxu0 %v1069_v42 }
  0x72   : > { %950 = vmatpush3.bf16.msra.mxu0 %v1070_v43 }
  0x73   : > { %951 = vmatprep.subr.bf16.mxu0 %v1071_v44 }
  0x76   : > { %952 = vmatpush3.bf16.msra.mxu0 %v1072_v45 }
  0x77   : > { %953 = vmatprep.subr.bf16.mxu0 %v1073_v46 }
  0x7a   : > { %954 = vmatpush3.bf16.msra.mxu0 %v1074_v47 }
  0x7b   : > { %955 = vmatprep.subr.bf16.mxu0 %v1075_v49 }
  0x7e   : > { %956 = vmatpush3.bf16.msra.mxu0 %v1076_v51 }
  0x7f   : > { %957 = vmatprep.subr.bf16.mxu0 %v1077_v52 }
  0x82   : > { %958 = vmatpush3.bf16.msra.mxu0 %v1078_v53 }
  0x83   : > { %959 = vmatprep.subr.bf16.mxu0 %v1079_v54 }
  0x86   : > { %960 = vmatpush3.bf16.msra.mxu0 %v1080_v55 }
  0x89   : > { %731 = vmatmul.mubr.bf16.vlgmr.msra.gmra.mxu0 %v847_v56 }
 0x129   : > { %v917_v57 = vpop.f32.mrf.mxu0 }
 0x12b   : > { %v918_v58 = vpop.f32.mrf.mxu0  ;;  %v939_v59 = vpop.f32.mrf.mxu1 }
 0x12c   : > { %v919_v1 = vadd.f32 %v918_v58, %v917_v57 }
 0x12d   : > { %v920_v60 = vpop.f32.mrf.mxu0  ;;  %v940_v61 = vpop.f32.mrf.mxu1 }
 0x12e   : > { %v653_v3 = vadd.f32 %v919_v1, %v842_v2  ;;  %v941_v4 = vadd.f32 %v940_v61, %v939_v59 }
 0x12f   : > { %v921_v62 = vpop.f32.mrf.mxu0  ;;  %v942_v63 = vpop.f32.mrf.mxu1 }
 0x130   : > { %v693_v7 = vadd.f32 %v941_v4, %v653_v3 }
 0x131   : > { %v943_v0 = vpop.f32.mrf.mxu1 }
 0x149   : > { %v961_v5 = vpop.f32.mrf.mxu0 }
 0x14b   : > { %v962_v6 = vpop.f32.mrf.mxu0 }
 0x14c   : > { %v963_v8 = vadd.f32 %v962_v6, %v961_v5 }
 0x14d   : > { %v964_v9 = vpop.f32.mrf.mxu0 }
 0x14e   : > { %v733_v10 = vadd.f32 %v963_v8, %v693_v7 }
 0x14f   : > { %v965_v11 = vpop.f32.mrf.mxu0 }
 0x150   : > { %v738_v12 = vpack.c.bf16 %v733_v10, %v733_v10 }
 0x152   : > { %739 = vst [vmem:[%s201_s23] sm:$0xf] %v738_v12 }
 0x153   : > { %1150 = shalt.err (!%p1147_p0)
}
 0x154   : > { %s1151_s11 = scalar_lea.hbm %s752_s30, 64  ;;  %s1155_s26 = scalar_lea.hbm %s1396_s3, 192 }
 0x155   : > { %p1152_p10 = scmp.ne.s32.totalorder %s752_s30, %s1151_s11  ;;  %p1156_p1 = scmp.lt.s32.totalorder %s752_s30, %s1396_s3 }
 0x156   : > { %p1157_p4 = scmp.lt.s32.totalorder %s1155_s26, %s1151_s11 }
 0x157   : > { %p1153_p9 = pnand %p1152_p10, %p1412_p3 }
 0x158   : > { %p1158_p6 = por %p1157_p4, %p1156_p1 }
 0x159   : > { %p1154_p11 = pneg %p1153_p9 }
 0x15b   : > { %p1159_p8 = pnand %p1158_p6, %p1154_p11 }
 0x15d   : > { %1162 = shalt.err (!%p1159_p8)
}
 0x15e   : > { %976 = dma.vmem_to_hbm [thread:$0]  (%p1412_p3), %s755_s25, 64, %s752_s30, %s741_s4  }
 0x15f PF: > { %p993_p5 = scmp.ge.s32.totalorder %s1205_s15, 2  ;;  %s766_s20 = sand.u32 1, %s1193_s12  }
 0x160   : > { %p1413_p7 = scmp.ne.s32.totalorder %s1402_s19, 0  ;;  %s767_s10 = scalar_lea.sflag [#allocation4], %s766_s20 }
 0x162   : > { %p987_p12 = pnand %p993_p5, %p1413_p7 }
 0x164   : > { %p988_p2 = pneg %p987_p12 }
 0x166   : > { %1188 = dma.done.wait (%p988_p2), %s767_s10, 64  }
 0x167   : > { %1190 = vsyncadd (%p988_p2), %s767_s10, 4294967232  ;;  %p17_p13 = scmp.ge.s32.totalorder %s1285_s24, 5   ;;  %s1414_s12 = smov %s1197_s13 }
 0x168   : > { %s1415_s13 = smov %s1201_s14  ;;  %s1416_s14 = smov %s1302_s5 }
 0x169   : > { %s1417_s15 = smov %s1285_s24  ;;  %19 = sbr.rel (!%p17_p13) target bundleno = 6 (0x6), region = 81 }
 0x16e   :  { %772 = vsyncpa [#allocation3], 1 }
 0x16f   :  { %774 = vsyncpa [#allocation3 + $0x1], 1 }
 0x170   :  { %775 = vsyncpa [#allocation6], 1 }
 0x171   :  { %776 = vsyncpa [#allocation4], 1 }
 0x172   :  { %778 = vsyncpa [#allocation4 + $0x1], 1 }

// kernel: tpu_custom_call.1
= control target key start
LH: loop header
LB: loop body
LE: loop exit
PB: predicated region body
PF: predicated region fallthrough
CT: control target
= control target key end

     0   :  { %8 = vsyncpa [#allocation3], 0  ;;  %s1393_s0 = inlined_call_operand.hbm [shape: bf16[24,768], index: 0, kind: input, shape index: {}]   ;;  %s1394_s1 = inlined_call_operand.hbm [shape: bf16[768,128], index: 1, kind: input, shape index: {}]   ;;  %s1395_s2 = inlined_call_operand.vmem [shape: f32[1,128], index: 2, kind: input, shape index: {}]   ;;  %s1396_s3 = inlined_call_operand.hbm [shape: bf16[24,128], index: 3, kind: output, shape index: {}]  }
   0x1   :  { %10 = vsyncpa [#allocation3 + $0x1], 0 }
   0x2   :  { %11 = vsyncpa [#allocation6], 0 }
   0x3   :  { %12 = vsyncpa [#allocation4], 0 }
   0x4   :  { %14 = vsyncpa [#allocation4 + $0x1], 0  ;;  %s1232_s12 = smov 0   ;;  %s1234_s13 = smov 0  }
   0x5   :  { %s1236_s14 = smov 0   ;;  %s1238_s15 = smov 0  }
   0x6 LB: > { %s1253_s16 = sadd.s32 4294967295, %s1205_s15   ;;  %s834_s17 = sadd.s32 4294967294, %s1205_s15   ;;  %s1205_s15 = sphi %s1238_s15, %s1417_s15   ;;  %s1201_s14 = sphi %s1236_s14, %s1416_s14   ;;  %s1197_s13 = sphi %s1234_s13, %s1415_s13   ;;  %s1193_s12 = sphi %s1232_s12, %s1414_s12  }
   0x7   : > { %p40_p0 = scmp.ne.s32.totalorder %s1197_s13, %s1193_s12  ;;  %p1397_p1 = scmp.eq.s32.totalorder %s1253_s16, 0 }
   0x8   : > { %p112_p3 = scmp.eq.s32.totalorder %s834_s17, 2  ;;  %p835_p5 = scmp.ge.s32.totalorder %s1205_s15, 1 }
   0x9   : > { %p1262_p4 = por %p1397_p1, %p40_p0  ;;  %p119_p7 = scmp.lt.s32.totalorder %s1205_s15, 4 }
   0xa   : > { %p1267_p6 = por %p112_p3, %p40_p0  ;;  %s1207_s21 = smov [#allocation5]  }
   0xb   : > { %s1401_s18 = scalar_select %p1262_p4, 1, 0 }
   0xc   : > { %s1402_s19 = scalar_select %p1267_p6, 1, 0 }
   0xd   : > { %p1272_p8 = pnand %p835_p5, %p119_p7  ;;  %s131_s22 = sshll.u32 %s1207_s21, 4  ;;  %s132_s22 = int_to_ptr.vmem [resolvable:$true] %s131_s22 }
   0xe   : > { %s1285_s24 = sadd.s32 1, %s1205_s15   ;;  %s27_s25 = sadd.s32 1, %s1201_s14 }
   0xf   : > { %s1403_s20 = scalar_select %p1272_p8, 1, 0 }
  0x10   : > { %p978_p9 = pneg %p1272_p8  ;;  %s24_s26 = ssub.s32 %s1205_s15, %s1285_s24 }
  0x11   : > { %s1094_s27 = scalar_lea.vmem %s132_s22, 6144  ;;  %p1102_p3 = scmp.lt.s32.totalorder %s132_s22, %s132_s22 }
  0x12   : > { %p1280_p10 = pnand %p978_p9, %p1397_p1  ;;  %p1095_p12 = scmp.ne.s32.totalorder %s132_s22, %s1094_s27 }
  0x13   : > { %p1103_p5 = scmp.lt.s32.totalorder %s1094_s27, %s1094_s27 }
  0x14   : > { %p1085_p11 = pneg %p1280_p10 }
  0x15   : > { %p1104_p7 = por %p1103_p5, %p1102_p3 }
  0x16   : > { %p1097_p13 = pnand %p1095_p12, %p1085_p11 }
  0x18   : > { %p1098_p0 = pneg %p1097_p13 }
  0x1a   : > { %p1105_p2 = pnand %p1104_p7, %p1098_p0 }
  0x1c   : > { %1108 = shalt.err (!%p1105_p2)
}
  0x1d   : > { %s1208_s28 = smov 64   ;;  %s1209_s29 = smov 4  }
  0x1e   : > { %981 = dma.hbm_to_vmem [thread:$0]  (!%p1280_p10), %s1394_s1, 6144, %s132_s22, [#allocation6], %s1208_s28, %s1208_s28, %s1209_s29  }
  0x1f   : > { %p25_p9 = scmp.eq.s32.totalorder %s24_s26, 0  ;;  %p34_p11 = scmp.ne.s32.totalorder %s1201_s14, %s1197_s13 }
  0x20   : > { %p35_p12 = scmp.eq.s32.totalorder %s1205_s15, 0  ;;  %p991_p2 = scmp.lt.s32.totalorder %s1205_s15, 3 }
  0x21   : > { %s1302_s5 = scalar_select %p25_p9, %s1201_s14, %s27_s25  }
  0x22   : > { %p36_p13 = por %p35_p12, %p34_p11  ;;  %p1405_p0 = scmp.eq.s32.totalorder %s1253_s16, 2 }
  0x23   : > { %s148_s7 = sand.u32 1, %s1201_s14   ;;  %s968_s8 = smul.u32 384, %s1205_s15 }
  0x24   : > { %p1306_p3 = por %p1405_p0, %p34_p11  ;;  %s967_s9 = smul.u32 24, %s148_s7 }
  0x25   : > { %p1312_p5 = pnand %p991_p2, %p36_p13  ;;  %s1319_s21 = scalar_lea.hbm %s1393_s0, %s968_s8 }
  0x26   : > { %s1406_s6 = scalar_select %p1306_p3, 1, 0 }
  0x27   : > { %s152_s22 = scalar_lea.vmem [#allocation2], %s967_s9  ;;  %s149_s25 = scalar_lea.sflag [#allocation3], %s148_s7 }
  0x28   : > { %s160_s23 = sshll.u32 %s152_s22, 4  ;;  %s1109_s26 = scalar_lea.hbm %s1319_s21, 384  ;;  %s161_s23 = int_to_ptr.vmem [resolvable:$true] %s160_s23 }
  0x29   : > { %p1110_p10 = scmp.ne.s32.totalorder %s1319_s21, %s1109_s26  ;;  %p1111_p7 = pneg %p1312_p5 }
  0x2a   : > { %s1114_s29 = scalar_lea.hbm %s1393_s0, 1152  ;;  %p1115_p12 = scmp.lt.s32.totalorder %s1319_s21, %s1393_s0 }
  0x2b   : > { %p1112_p9 = pnand %p1111_p7, %p1110_p10  ;;  %p1116_p2 = scmp.lt.s32.totalorder %s1114_s29, %s1109_s26 }
  0x2d   : > { %p1113_p11 = pneg %p1112_p9  ;;  %p1117_p13 = por %p1116_p2, %p1115_p12 }
  0x2f   : > { %p1118_p0 = pnand %p1117_p13, %p1113_p11 }
  0x31   : > { %1121 = shalt.err (!%p1118_p0)
}
  0x32   : > { %s1122_s8 = scalar_lea.vmem %s161_s23, 384  ;;  %s1210_s7 = smov [#allocation2]  }
  0x33   : > { %p1123_p1 = scmp.ne.s32.totalorder %s161_s23, %s1122_s8  ;;  %s1127_s9 = sshll.u32 %s1210_s7, 4  ;;  %s1128_s9 = int_to_ptr.vmem [resolvable:$false] %s1127_s9 }
  0x34   : > { %s1129_s11 = scalar_lea.vmem %s1128_s9, 768  ;;  %p1130_p10 = scmp.lt.s32.totalorder %s161_s23, %s1128_s9 }
  0x35   : > { %p1125_p6 = pnand %p1123_p1, %p1111_p7  ;;  %p1131_p9 = scmp.lt.s32.totalorder %s1129_s11, %s1122_s8 }
  0x37   : > { %p1126_p3 = pneg %p1125_p6  ;;  %p1132_p4 = por %p1131_p9, %p1130_p10 }
  0x39   : > { %p1133_p8 = pnand %p1132_p4, %p1126_p3 }
  0x3b   : > { %1136 = shalt.err (!%p1133_p8)
}
  0x3c   : > { %985 = dma.hbm_to_vmem [thread:$0]  (!%p1312_p5), %s1319_s21, 384, %s161_s23, %s149_s25  }
  0x3d   : > { %p1408_p11 = scmp.ne.s32.totalorder %s1403_s20, 0 }
  0x3e   : > { %s1338_s17 = sand.u32 (!%p1408_p11), 1, %s1197_s13   ;;  %p1409_p1 = scmp.ne.s32.totalorder (!%p1408_p11), %s1401_s18, 0 }
  0x3f   : > { %169 = sbr.rel (%p1408_p11) target bundleno = 351 (0x15f), region = 32  ;;  %s172_s26 = scalar_lea.sflag (!%p1408_p11), [#allocation3], %s1338_s17 }
  0x40   : > { %s969_s22 = smul.u32 (!%p1408_p11), 24, %s1338_s17 }
  0x42   : > { %s1342_s27 = scalar_lea.vmem (!%p1408_p11), [#allocation2], %s969_s22 }
  0x44   : > { %1180 = dma.done.wait (%p1409_p1), %s172_s26, 384  }
  0x45   : > { %1182 = vsyncadd (%p1409_p1), %s172_s26, 4294966912  ;;  %p1410_p4 = scmp.eq.s32.totalorder %s1253_s16, 0 }
  0x47   : > { %1184 = dma.done.wait (%p1410_p4), [#allocation6], 6144   ;;  %p1411_p6 = pmov %p1410_p4 }
  0x48   : > { %v1029_v0 = vld [vmem:[#allocation5 + $0x78] sm:$0xff]   ;;  %v1033_v4 = vld [vmem:[#allocation5 + $0x70] sm:$0xff]   ;;  %v1037_v8 = vld [vmem:[#allocation5 + $0x68] sm:$0xff]   ;;  %s841_s10 = sshll.u32 %s1338_s17, 2  ;;  %s898_s21 = sshll.u32 %s1253_s16, 6 }
  0x49   : > { %1186 = vsyncadd (%p1411_p6), [#allocation6], 4294961152  ;;  %v1030_v1 = vld [vmem:[#allocation5 + $0x38] sm:$0xff]   ;;  %901 = vmatprep.subr.bf16.mxu0 %v1029_v0  ;;  %v1034_v5 = vld [vmem:[#allocation5 + $0x30] sm:$0xff]   ;;  %s201_s23 = scalar_lea.vmem [#allocation7], %s841_s10  ;;  %s752_s30 = scalar_lea.hbm %s1396_s3, %s898_s21 }
  0x4a   : > { %v1031_v2 = vld [vmem:[#allocation5 + $0xf8] sm:$0xff]   ;;  %902 = vmatpush3.bf16.msra.mxu0 %v1030_v1  ;;  %v1035_v6 = vld [vmem:[#allocation5 + $0xf0] sm:$0xff]   ;;  %v1038_v9 = vld [vmem:[#allocation5 + $0x28] sm:$0xff]   ;;  %s754_s25 = sshll.u32 %s201_s23, 4  ;;  %s741_s4 = scalar_lea.sflag [#allocation4], %s1338_s17  ;;  %s755_s25 = int_to_ptr.vmem [resolvable:$true] %s754_s25 }
  0x4b   : > { %v1032_v3 = vld [vmem:[#allocation5 + $0xb8] sm:$0xff]   ;;  %923 = vmatprep.subr.bf16.mxu1 %v1031_v2  ;;  %903 = vmatprep.subr.bf16.mxu0 %v1033_v4  ;;  %v1036_v7 = vld [vmem:[#allocation5 + $0xb0] sm:$0xff]   ;;  %v1039_v10 = vld [vmem:[#allocation5 + $0xe8] sm:$0xff]   ;;  %s1137_s8 = scalar_lea.vmem %s755_s25, 64  ;;  %p1412_p3 = scmp.ne.s32.totalorder %s1406_s6, 0 }
  0x4c   : > { %924 = vmatpush3.bf16.msra.mxu1 %v1032_v3  ;;  %v1040_v11 = vld [vmem:[#allocation5 + $0xa8] sm:$0xff]   ;;  %v1041_v12 = vld [vmem:[#allocation5 + $0x60] sm:$0xff]   ;;  %v1045_v16 = vld [vmem:[#allocation5 + $0x58] sm:$0xff]   ;;  %p1138_p8 = scmp.ne.s32.totalorder %s755_s25, %s1137_s8  ;;  %s1211_s7 = smov [#allocation7]  }
  0x4d   : > { %925 = vmatprep.subr.bf16.mxu1 %v1035_v6  ;;  %v1042_v13 = vld [vmem:[#allocation5 + $0x20] sm:$0xff]   ;;  %v1046_v17 = vld [vmem:[#allocation5 + $0x18] sm:$0xff]   ;;  %v1049_v20 = vld [vmem:[#allocation5 + $0x50] sm:$0xff]   ;;  %s1141_s9 = sshll.u32 %s1211_s7, 4  ;;  %s1142_s9 = int_to_ptr.vmem [resolvable:$false] %s1141_s9 }
  0x4e   : > { %904 = vmatpush3.bf16.msra.mxu0 %v1034_v5  ;;  %v1043_v14 = vld [vmem:[#allocation5 + $0xe0] sm:$0xff]   ;;  %v1047_v18 = vld [vmem:[#allocation5 + $0xd8] sm:$0xff]   ;;  %v1050_v21 = vld [vmem:[#allocation5 + $0x10] sm:$0xff]   ;;  %p1139_p5 = pnand %p1138_p8, %p1412_p3  ;;  %s1143_s16 = scalar_lea.vmem %s1142_s9, 128 }
  0x4f   : > { %905 = vmatprep.subr.bf16.mxu0 %v1037_v8  ;;  %v1044_v15 = vld [vmem:[#allocation5 + $0xa0] sm:$0xff]   ;;  %v1048_v19 = vld [vmem:[#allocation5 + $0x98] sm:$0xff]   ;;  %v1051_v22 = vld [vmem:[#allocation5 + $0xd0] sm:$0xff]   ;;  %p1144_p12 = scmp.lt.s32.totalorder %s755_s25, %s1142_s9  ;;  %p1145_p2 = scmp.lt.s32.totalorder %s1143_s16, %s1137_s8 }
  0x50   : > { %926 = vmatpush3.bf16.msra.mxu1 %v1036_v7  ;;  %v1052_v23 = vld [vmem:[#allocation5 + $0x90] sm:$0xff]   ;;  %v1053_v24 = vld [vmem:[#allocation5 + $0x48] sm:$0xff]   ;;  %v1057_v28 = vld [vmem:[#allocation5 + $0x40] sm:$0xff]   ;;  %p1140_p7 = pneg %p1139_p5 }
  0x51   : > { %927 = vmatprep.subr.bf16.mxu1 %v1039_v10  ;;  %v1054_v25 = vld [vmem:[#allocation5 + $0x8] sm:$0xff]   ;;  %v1058_v29 = vld [vmem:[#allocation5] sm:$0xff]   ;;  %v1063_v35 = vld [vmem:[#allocation5 + $0x178] sm:$0xff]   ;;  %p1146_p13 = por %p1145_p2, %p1144_p12 }
  0x52   : > { %906 = vmatpush3.bf16.msra.mxu0 %v1038_v9  ;;  %v1055_v26 = vld [vmem:[#allocation5 + $0xc8] sm:$0xff]   ;;  %v1059_v30 = vld [vmem:[#allocation5 + $0xc0] sm:$0xff]   ;;  %v204_v36 = vld [vmem:[%s1342_s27 + $0x8] sm:$0xff] }
  0x53   : > { %907 = vmatprep.subr.bf16.mxu0 %v1041_v12  ;;  %v1056_v27 = vld [vmem:[#allocation5 + $0x88] sm:$0xff]   ;;  %v1062_v34 = vld [vmem:[#allocation5 + $0x80] sm:$0xff]   ;;  %v845_v37 = vcombine.low %v204_v36, %v204_v36  ;;  %v846_v38 = vcombine.high %v204_v36, %v204_v36  ;;  %v1066_v39 = vld [vmem:[#allocation5 + $0x138] sm:$0xff]   ;;  %p1147_p0 = pnand %p1146_p13, %p1140_p7 }
  0x54   : > { %928 = vmatpush3.bf16.msra.mxu1 %v1040_v11  ;;  %v203_v31 = vld [vmem:[%s1342_s27] sm:$0xff]  ;;  %v1071_v44 = vld [vmem:[#allocation5 + $0x160] sm:$0xff]   ;;  %v1073_v46 = vld [vmem:[#allocation5 + $0x158] sm:$0xff]  }
  0x55   : > { %929 = vmatprep.subr.bf16.mxu1 %v1043_v14  ;;  %v843_v32 = vcombine.low %v203_v31, %v203_v31  ;;  %v844_v33 = vcombine.high %v203_v31, %v203_v31  ;;  %v1067_v40 = vld [vmem:[#allocation5 + $0x170] sm:$0xff]   ;;  %690 = vmatprep.mubr.bf16.mxu1 %v846_v38  ;;  %v1069_v42 = vld [vmem:[#allocation5 + $0x168] sm:$0xff]   ;;  %v1072_v45 = vld [vmem:[#allocation5 + $0x120] sm:$0xff]  }
  0x56   : > { %908 = vmatpush3.bf16.msra.mxu0 %v1042_v13  ;;  %v1068_v41 = vld [vmem:[#allocation5 + $0x130] sm:$0xff]   ;;  %v1070_v43 = vld [vmem:[#allocation5 + $0x128] sm:$0xff]   ;;  %v1074_v47 = vld [vmem:[#allocation5 + $0x118] sm:$0xff]  }
  0x57   : > { %909 = vmatprep.subr.bf16.mxu0 %v1045_v16  ;;  %650 = vmatprep.mubr.bf16.mxu0 %v844_v33  ;;  %v205_v48 = vld [vmem:[%s1342_s27 + $0x10] sm:$0xff]  ;;  %v1075_v49 = vld [vmem:[#allocation5 + $0x150] sm:$0xff]   ;;  %v1077_v52 = vld [vmem:[#allocation5 + $0x148] sm:$0xff]  }
  0x58   : > { %930 = vmatpush3.bf16.msra.mxu1 %v1044_v15  ;;  %v848_v50 = vcombine.high %v205_v48, %v205_v48  ;;  %v1076_v51 = vld [vmem:[#allocation5 + $0x110] sm:$0xff]   ;;  %v1078_v53 = vld [vmem:[#allocation5 + $0x108] sm:$0xff]   ;;  %v1079_v54 = vld [vmem:[#allocation5 + $0x140] sm:$0xff]   ;;  %v847_v56 = vcombine.low %v205_v48, %v205_v48 }
  0x59   : > { %931 = vmatprep.subr.bf16.mxu1 %v1047_v18  ;;  %v1080_v55 = vld [vmem:[#allocation5 + $0x100] sm:$0xff]   ;;  %v842_v2 = vld [vmem:[%s1395_s2] ss:$0 sm:$0xff] }
  0x5a   : > { %910 = vmatpush3.bf16.msra.mxu0 %v1046_v17 }
  0x5b   : > { %911 = vmatprep.subr.bf16.mxu0 %v1049_v20 }
  0x5c   : > { %932 = vmatpush3.bf16.msra.mxu1 %v1048_v19 }
  0x5d   : > { %933 = vmatprep.subr.bf16.mxu1 %v1051_v22 }
  0x5e   : > { %912 = vmatpush3.bf16.msra.mxu0 %v1050_v21 }
  0x5f   : > { %913 = vmatprep.subr.bf16.mxu0 %v1053_v24 }
  0x60   : > { %934 = vmatpush3.bf16.msra.mxu1 %v1052_v23 }
  0x61   : > { %935 = vmatprep.subr.bf16.mxu1 %v1055_v26 }
  0x62   : > { %914 = vmatpush3.bf16.msra.mxu0 %v1054_v25 }
  0x63   : > { %915 = vmatprep.subr.bf16.mxu0 %v1057_v28 }
  0x64   : > { %936 = vmatpush3.bf16.msra.mxu1 %v1056_v27 }
  0x65   : > { %937 = vmatprep.subr.bf16.mxu1 %v1059_v30 }
  0x66   : > { %916 = vmatpush3.bf16.msra.mxu0 %v1058_v29 }
  0x67   : > { %945 = vmatprep.subr.bf16.mxu0 %v1063_v35 }
  0x68   : > { %938 = vmatpush3.bf16.msra.mxu1 %v1062_v34 }
  0x69   : > { %651 = vmatmul.mubr.bf16.vlgmr.msra.gmra.mxu0 %v843_v32 }
  0x6a   : > { %946 = vmatpush3.bf16.msra.mxu0 %v1066_v39  ;;  %730 = vmatprep.mubr.bf16.mxu0 %v848_v50 }
  0x6b   : > { %691 = vmatmul.mubr.bf16.vlgmr.msra.gmra.mxu1 %v845_v37  ;;  %947 = vmatprep.subr.bf16.mxu0 %v1067_v40 }
  0x6e   : > { %948 = vmatpush3.bf16.msra.mxu0 %v1068_v41 }
  0x6f   : > { %949 = vmatprep.subr.bf16.mxu0 %v1069_v42 }
  0x72   : > { %950 = vmatpush3.bf16.msra.mxu0 %v1070_v43 }
  0x73   : > { %951 = vmatprep.subr.bf16.mxu0 %v1071_v44 }
  0x76   : > { %952 = vmatpush3.bf16.msra.mxu0 %v1072_v45 }
  0x77   : > { %953 = vmatprep.subr.bf16.mxu0 %v1073_v46 }
  0x7a   : > { %954 = vmatpush3.bf16.msra.mxu0 %v1074_v47 }
  0x7b   : > { %955 = vmatprep.subr.bf16.mxu0 %v1075_v49 }
  0x7e   : > { %956 = vmatpush3.bf16.msra.mxu0 %v1076_v51 }
  0x7f   : > { %957 = vmatprep.subr.bf16.mxu0 %v1077_v52 }
  0x82   : > { %958 = vmatpush3.bf16.msra.mxu0 %v1078_v53 }
  0x83   : > { %959 = vmatprep.subr.bf16.mxu0 %v1079_v54 }
  0x86   : > { %960 = vmatpush3.bf16.msra.mxu0 %v1080_v55 }
  0x89   : > { %731 = vmatmul.mubr.bf16.vlgmr.msra.gmra.mxu0 %v847_v56 }
 0x129   : > { %v917_v57 = vpop.f32.mrf.mxu0 }
 0x12b   : > { %v918_v58 = vpop.f32.mrf.mxu0  ;;  %v939_v59 = vpop.f32.mrf.mxu1 }
 0x12c   : > { %v919_v1 = vadd.f32 %v918_v58, %v917_v57 }
 0x12d   : > { %v920_v60 = vpop.f32.mrf.mxu0  ;;  %v940_v61 = vpop.f32.mrf.mxu1 }
 0x12e   : > { %v653_v3 = vadd.f32 %v919_v1, %v842_v2  ;;  %v941_v4 = vadd.f32 %v940_v61, %v939_v59 }
 0x12f   : > { %v921_v62 = vpop.f32.mrf.mxu0  ;;  %v942_v63 = vpop.f32.mrf.mxu1 }
 0x130   : > { %v693_v7 = vadd.f32 %v941_v4, %v653_v3 }
 0x131   : > { %v943_v0 = vpop.f32.mrf.mxu1 }
 0x149   : > { %v961_v5 = vpop.f32.mrf.mxu0 }
 0x14b   : > { %v962_v6 = vpop.f32.mrf.mxu0 }
 0x14c   : > { %v963_v8 = vadd.f32 %v962_v6, %v961_v5 }
 0x14d   : > { %v964_v9 = vpop.f32.mrf.mxu0 }
 0x14e   : > { %v733_v10 = vadd.f32 %v963_v8, %v693_v7 }
 0x14f   : > { %v965_v11 = vpop.f32.mrf.mxu0 }
 0x150   : > { %v738_v12 = vpack.c.bf16 %v733_v10, %v733_v10 }
 0x152   : > { %739 = vst [vmem:[%s201_s23] sm:$0xf] %v738_v12 }
 0x153   : > { %1150 = shalt.err (!%p1147_p0)
}
 0x154   : > { %s1151_s11 = scalar_lea.hbm %s752_s30, 64  ;;  %s1155_s26 = scalar_lea.hbm %s1396_s3, 192 }
 0x155   : > { %p1152_p10 = scmp.ne.s32.totalorder %s752_s30, %s1151_s11  ;;  %p1156_p1 = scmp.lt.s32.totalorder %s752_s30, %s1396_s3 }
 0x156   : > { %p1157_p4 = scmp.lt.s32.totalorder %s1155_s26, %s1151_s11 }
 0x157   : > { %p1153_p9 = pnand %p1152_p10, %p1412_p3 }
 0x158   : > { %p1158_p6 = por %p1157_p4, %p1156_p1 }
 0x159   : > { %p1154_p11 = pneg %p1153_p9 }
 0x15b   : > { %p1159_p8 = pnand %p1158_p6, %p1154_p11 }
 0x15d   : > { %1162 = shalt.err (!%p1159_p8)
}
 0x15e   : > { %976 = dma.vmem_to_hbm [thread:$0]  (%p1412_p3), %s755_s25, 64, %s752_s30, %s741_s4  }
 0x15f PF: > { %p993_p5 = scmp.ge.s32.totalorder %s1205_s15, 2  ;;  %s766_s20 = sand.u32 1, %s1193_s12  }
 0x160   : > { %p1413_p7 = scmp.ne.s32.totalorder %s1402_s19, 0  ;;  %s767_s10 = scalar_lea.sflag [#allocation4], %s766_s20 }
 0x162   : > { %p987_p12 = pnand %p993_p5, %p1413_p7 }
 0x164   : > { %p988_p2 = pneg %p987_p12 }
 0x166   : > { %1188 = dma.done.wait (%p988_p2), %s767_s10, 64  }
 0x167   : > { %1190 = vsyncadd (%p988_p2), %s767_s10, 4294967232  ;;  %p17_p13 = scmp.ge.s32.totalorder %s1285_s24, 5   ;;  %s1414_s12 = smov %s1197_s13 }
 0x168   : > { %s1415_s13 = smov %s1201_s14  ;;  %s1416_s14 = smov %s1302_s5 }
 0x169   : > { %s1417_s15 = smov %s1285_s24  ;;  %19 = sbr.rel (!%p17_p13) target bundleno = 6 (0x6), region = 81 }
 0x16e   :  { %772 = vsyncpa [#allocation3], 1 }
 0x16f   :  { %774 = vsyncpa [#allocation3 + $0x1], 1 }
 0x170   :  { %775 = vsyncpa [#allocation6], 1 }
 0x171   :  { %776 = vsyncpa [#allocation4], 1 }
 0x172   :  { %778 = vsyncpa [#allocation4 + $0x1], 1 }

</bundles_post_ra>
